<compile_context>
chip_gen: v7x
topology: tpu7x:2x2x1
jax: 0.10.0
libtpu: 0.0.40
codegen_flags: <defaults>
</compile_context>

<pallas_src>
import math

import jax
import jax.numpy as jnp
from jax.experimental import pallas as pl
from jax.experimental.pallas import tpu as pltpu


def _copy_kernel(x_ref, o_ref):
    # Straight element-wise copy of the current VMEM tile.
    o_ref[...] = x_ref[...]


def _vmem_limit_bytes() -> int:
    """Generation-aware scoped-VMEM budget (conservative fallback: 32 MiB)."""
    try:
        info = pltpu.get_tpu_info()
        phys = int(getattr(info, "vmem_capacity_bytes", 0) or 0)
        if phys > 0:
            # Use at most half of physical VMEM, capped at 64 MiB
            # (v5e/v6e: 128 MiB phys -> 64 MiB; v7x: 64 MiB phys -> 32 MiB).
            return min(phys // 2, 64 * 1024 * 1024)
    except Exception:
        pass
    return 32 * 1024 * 1024


def resnet_forward(x: jax.Array) -> jax.Array:
    """Pallas implementation of ResNet.forward (identity on the NCHW input)."""
    orig_shape = x.shape
    orig_dtype = x.dtype
    total = math.prod(orig_shape) if orig_shape else 1
    if total == 0:
        return x

    itemsize = jnp.dtype(orig_dtype).itemsize
    # Sublane multiple for this dtype (f32: 8, bf16: 16, int8: 32).
    sub = max(8, (32 // itemsize) * 8)
    lane_unit = 128

    flat = x.reshape(-1)

    # Pad the flat length to a multiple of sub*128 so the kernel always sees a
    # lane-dense (rows, k*128) view (no sub-128 last dim / masked vst.msk).
    unit = sub * lane_unit
    padded_total = ((total + unit - 1) // unit) * unit
    if padded_total != total:
        flat = jnp.pad(flat, (0, padded_total - total))

    # Pick the widest lane dim (multiple of 128) that keeps rows a multiple of
    # `sub`: wider rows -> fewer sublane rows per tile, fewer DMA descriptors.
    lane = lane_unit
    for k in (32, 16, 8, 4, 2):
        w = lane_unit * k
        if padded_total % (w * sub) == 0:
            lane = w
            break
    rows = padded_total // lane
    x2d = flat.reshape(rows, lane)

    # Tile sizing: 2 input + 2 output double-buffered tiles must fit the
    # scoped VMEM budget with ~20% headroom. Multi-MiB tiles amortize the
    # ~0.35us per-grid-step overhead and reach ~85%+ of the HBM roofline.
    vmem_limit = _vmem_limit_bytes()
    tile_bytes = (vmem_limit * 4) // (5 * 4)  # 80% of budget / 4 live buffers
    tile_rows = max(sub, (tile_bytes // (lane * itemsize)) // sub * sub)
    tile_rows = min(tile_rows, rows)

    # Give megacore (v7x: 2 TCs/chip) at least two grid steps when possible.
    if tile_rows >= rows and rows >= 2 * sub:
        half = ((rows // 2 + sub - 1) // sub) * sub
        tile_rows = min(rows, half)

    grid = (pl.cdiv(rows, tile_rows),)

    out2d = pl.pallas_call(
        _copy_kernel,
        out_shape=jax.ShapeDtypeStruct((rows, lane), orig_dtype),
        grid_spec=pltpu.PrefetchScalarGridSpec(
            num_scalar_prefetch=0,
            grid=grid,
            in_specs=[pl.BlockSpec((tile_rows, lane), lambda i: (i, 0))],
            out_specs=pl.BlockSpec((tile_rows, lane), lambda i: (i, 0)),
        ),
        # Output aliases the input buffer: when the caller can donate, no new
        # HBM allocation is made for this identity op.
        input_output_aliases={0: 0},
        compiler_params=pltpu.CompilerParams(
            dimension_semantics=("parallel",),
            vmem_limit_bytes=vmem_limit,
        ),
    )(x2d)

    out_flat = out2d.reshape(-1)
    if padded_total != total:
        out_flat = out_flat[:total]
    return out_flat.reshape(orig_shape)


if __name__ == "__main__":
    key = jax.random.PRNGKey(0)
    # Small NCHW input consistent with a ResNet-style conv-net entry point.
    x = jax.random.normal(key, (2, 4, 16, 16), dtype=jnp.float32)

    y = resnet_forward(x)
    y = jax.block_until_ready(y)

    # Verify identity semantics (forward returns input unchanged).
    assert y.shape == x.shape and y.dtype == x.dtype
    assert bool(jnp.array_equal(y, x))

    print("KERNEL_OK")
</pallas_src>

<mosaic_0001>
module attributes {stable_mosaic.version = 11 : i64} {
  func.func @_copy_kernel(%arg0: i32, %arg1: memref<64x128xf32, #tpu.memory_space<vmem>>, %arg2: memref<64x128xf32, #tpu.memory_space<vmem>>) attributes {dimension_semantics = [#tpu.dimension_semantics<parallel>], iteration_bounds = array<i64: 1>, scalar_prefetch = 0 : i64, scratch_operands = 0 : i64, tpu.core_type = #tpu.core_type<tc>, window_params = [{transform_indices = @transform_0, window_bounds = array<i64: 64, 128>}, {transform_indices = @transform_1, window_bounds = array<i64: 64, 128>}]} {
    %c0 = arith.constant 0 : index
    %c0_0 = arith.constant 0 : index
    %0 = vector.load %arg1[%c0, %c0_0] : memref<64x128xf32, #tpu.memory_space<vmem>>, vector<64x128xf32>
    %c0_1 = arith.constant 0 : index
    %c0_2 = arith.constant 0 : index
    %1 = vector.load %arg2[%c0_1, %c0_2] : memref<64x128xf32, #tpu.memory_space<vmem>>, vector<64x128xf32>
    tpu.vector_store %arg2[%c0_1, %c0_2], %0 {strides = array<i32>} : memref<64x128xf32, #tpu.memory_space<vmem>>, vector<64x128xf32>,
    return
  }
  func.func @transform_0(%arg0: i32) -> (i32, i32) {
    %c0_i32 = arith.constant 0 : i32
    %c0_i32_0 = arith.constant 0 : i32
    return %arg0, %c0_i32 : i32, i32
  }
  func.func @transform_1(%arg0: i32) -> (i32, i32) {
    %c0_i32 = arith.constant 0 : i32
    %c0_i32_0 = arith.constant 0 : i32
    return %arg0, %c0_i32 : i32, i32
  }
}

</mosaic_0001>

<bundles_post_ra>
// kernel: tpu_custom_call.1
= control target key start
LH: loop header
LB: loop body
LE: loop exit
PB: predicated region body
PF: predicated region fallthrough
CT: control target
= control target key end

     0   :  { %6 = vsyncpa [#allocation3], 0  ;;  %s152_s0 = inlined_call_operand.hbm [shape: f32[64,128], index: 0, kind: input, shape index: {}, may-alias: {0,1}]   ;;  %s153_s1 = inlined_call_operand.hbm [shape: f32[64,128], index: 1, kind: output, shape index: {}, may-alias: {0,1}]  }
   0x1   :  { %7 = vsyncpa [#allocation4], 0  ;;  %s108_s6 = smov [#allocation2]   ;;  %s60_s10 = scalar_lea.hbm %s152_s0, 1024 }
   0x2   :  { %s13_s7 = sshll.u32 %s108_s6, 4  ;;  %p61_p0 = scmp.ne.s32.totalorder %s152_s0, %s60_s10  ;;  %s14_s7 = int_to_ptr.vmem [resolvable:$true] %s13_s7 }
   0x3   :  { %p64_p1 = scmp.lt.u32.totalorder %s60_s10, %s152_s0 }
   0x5   :  { %p66_p2 = pnand %p64_p1, %p61_p0 }
   0x7   :  { %69 = shalt.err (!%p66_p2)
}
   0x8   :  { %s70_s15 = scalar_lea.vmem %s14_s7, 1024  ;;  %p75_p4 = scmp.lt.s32.totalorder %s14_s7, %s14_s7 }
   0x9   :  { %p71_p3 = scmp.ne.s32.totalorder %s14_s7, %s70_s15  ;;  %p76_p5 = scmp.lt.s32.totalorder %s70_s15, %s70_s15 }
   0xb   :  { %p77_p6 = por %p76_p5, %p75_p4 }
   0xd   :  { %p78_p7 = pnand %p77_p6, %p71_p3 }
   0xf   :  { %81 = shalt.err (!%p78_p7)
}
  0x10   :  { %s109_s16 = smov 128   ;;  %s110_s17 = smov 8  }
  0x11   :  { %19 = dma.hbm_to_vmem [thread:$0]  %s152_s0, 1024, %s14_s7, [#allocation3], %s109_s16, %s109_s16, %s110_s17  }
  0x12   :  { %104 = dma.done.wait [#allocation3], 1024  }
  0x13   :  { %105 = vsyncadd [#allocation3], 4294966272  ;;  %s111_s20 = smov [#allocation5]   ;;  %v23_v0 = vld [vmem:[#allocation2] sm:$0xff]  ;;  %v24_v1 = vld [vmem:[#allocation2 + $0x8] sm:$0xff] }
  0x14   :  { %s44_s21 = sshll.u32 %s111_s20, 4  ;;  %v25_v2 = vld [vmem:[#allocation2 + $0x10] sm:$0xff]  ;;  %31 = vst [vmem:[#allocation5] sm:$0xff] %v23_v0  ;;  %32 = vst [vmem:[#allocation5 + $0x8] sm:$0xff] %v24_v1  ;;  %v26_v3 = vld [vmem:[#allocation2 + $0x18] sm:$0xff]  ;;  %s45_s21 = int_to_ptr.vmem [resolvable:$true] %s44_s21 }
  0x15   :  { %33 = vst [vmem:[#allocation5 + $0x10] sm:$0xff] %v25_v2  ;;  %v27_v4 = vld [vmem:[#allocation2 + $0x20] sm:$0xff]  ;;  %v28_v5 = vld [vmem:[#allocation2 + $0x28] sm:$0xff]  ;;  %34 = vst [vmem:[#allocation5 + $0x18] sm:$0xff] %v26_v3  ;;  %s82_s0 = scalar_lea.vmem %s45_s21, 1024  ;;  %p87_p9 = scmp.lt.s32.totalorder %s45_s21, %s45_s21 }
  0x16   :  { %35 = vst [vmem:[#allocation5 + $0x20] sm:$0xff] %v27_v4  ;;  %36 = vst [vmem:[#allocation5 + $0x28] sm:$0xff] %v28_v5  ;;  %v29_v6 = vld [vmem:[#allocation2 + $0x30] sm:$0xff]  ;;  %v30_v7 = vld [vmem:[#allocation2 + $0x38] sm:$0xff]  ;;  %p83_p8 = scmp.ne.s32.totalorder %s45_s21, %s82_s0  ;;  %p88_p10 = scmp.lt.s32.totalorder %s82_s0, %s82_s0 }
  0x17   :  { %37 = vst [vmem:[#allocation5 + $0x30] sm:$0xff] %v29_v6  ;;  %38 = vst [vmem:[#allocation5 + $0x38] sm:$0xff] %v30_v7 }
  0x18   :  { %p89_p11 = por %p88_p10, %p87_p9 }
  0x1a   :  { %p90_p12 = pnand %p89_p11, %p83_p8 }
  0x1c   :  { %93 = shalt.err (!%p90_p12)
}
  0x1d   :  { %s94_s24 = scalar_lea.hbm %s153_s1, 1024 }
  0x1e   :  { %p95_p13 = scmp.ne.s32.totalorder %s153_s1, %s94_s24  ;;  %p98_p0 = scmp.lt.u32.totalorder %s94_s24, %s153_s1 }
  0x20   :  { %p100_p1 = pnand %p98_p0, %p95_p13 }
  0x22   :  { %103 = shalt.err (!%p100_p1)
}
  0x23   :  { %50 = dma.vmem_to_hbm [thread:$0]  %s45_s21, 1024, %s153_s1, [#allocation4], %s109_s16, %s109_s16, %s110_s17  }
  0x24   :  { %106 = dma.done.wait [#allocation4], 1024  }
  0x25   :  { %107 = vsyncadd [#allocation4], 4294966272 }
  0x26   :  { %54 = vsyncpa [#allocation3], 1 }
  0x27   :  { %55 = vsyncpa [#allocation4], 1 }

</bundles_post_ra>
